<compile_context>
chip_gen: v7x
topology: tpu7x:2x2x1
jax: 0.10.0
libtpu: 0.0.40
codegen_flags: <defaults>
</compile_context>

<pallas_src>
import functools

import numpy as np
import jax
import jax.numpy as jnp
from jax.experimental import pallas as pl
from jax.experimental.pallas import tpu as pltpu


# ----------------------------------------------------------------------------
# Nearest-neighbour index math (PyTorch 'nearest': src = floor(dst * in / out))
# ----------------------------------------------------------------------------
def _nearest_indices(out_size: int, in_size: int) -> np.ndarray:
    # TODO(synk): PyTorch legacy 'nearest' evaluates floor(dst * (in/out)) in
    # float; the exact-integer form below can differ in rare non-integer-ratio
    # edge cases.
    idx = (np.arange(out_size, dtype=np.int64) * in_size) // out_size
    return np.clip(idx, 0, in_size - 1).astype(np.int32)


def _row_runs(hi: np.ndarray):
    """Group output rows into contiguous runs.

    Returns a tuple of (kind, src_start, dst_start, length):
      'bcast': output rows [dst, dst+len) all read input row src.
      'copy' : output rows [dst, dst+len) read input rows [src, src+len).
    """
    runs = []
    o, n = 0, len(hi)
    while o < n:
        s = int(hi[o])
        r = 1
        while o + r < n and int(hi[o + r]) == s:
            r += 1
        runs.append(["bcast", s, o, r])
        o += r
    merged = []
    for kind, s, d, r in runs:
        if r == 1:
            if (merged and merged[-1][0] == "copy"
                    and merged[-1][1] + merged[-1][3] == s
                    and merged[-1][2] + merged[-1][3] == d):
                merged[-1][3] += 1
            else:
                merged.append(["copy", s, d, 1])
        else:
            merged.append([kind, s, d, r])
    return tuple(tuple(x) for x in merged)


# ----------------------------------------------------------------------------
# Kernel
# ----------------------------------------------------------------------------
def _resize_kernel(x_ref, wi_ref, o_ref, *, c_tile, h_in, w_in, w_out,
                   row_runs, w_identity, precision):
    # x_ref : (c_tile, H_in, W_in)   image slab, native dtype
    # wi_ref: (1, W_out) int32       source column per output column
    # o_ref : (c_tile, H_out, W_out)
    x = x_ref[...]
    if w_identity:
        y = x.astype(o_ref.dtype)
    else:
        # One batched lane gather: (c_tile*H_in, W_in) @ one-hot(W_in, W_out).
        # Leading-dim merge is layout-free; M = c_tile*H_in fills the MXU.
        x2 = x.reshape(c_tile * h_in, w_in)
        src = jax.lax.broadcasted_iota(jnp.int32, (w_in, w_out), 0)
        sel = (src == wi_ref[...]).astype(x.dtype)      # built on VPU, no HBM
        y2 = jnp.dot(x2, sel, preferred_element_type=jnp.float32,
                     precision=precision)
        y = y2.astype(o_ref.dtype).reshape(c_tile, h_in, w_out)
    # H gather: static sublane copies / broadcasts, no MXU flops.
    # TODO(synk): for exact integer H ratios a single broadcast+reshape store
    # could replace the per-run masked stores once that reshape lowering is
    # verified on the target Mosaic toolchain.
    for kind, s, d, ln in row_runs:
        if kind == "copy":
            o_ref[:, d:d + ln, :] = y[:, s:s + ln, :]
        else:
            o_ref[:, d:d + ln, :] = jnp.broadcast_to(
                y[:, s:s + 1, :], (c_tile, ln, w_out))


# ----------------------------------------------------------------------------
# VMEM sizing (generation aware) and c_tile selection
# ----------------------------------------------------------------------------
def _ceil_to(a, m):
    return -(-a // m) * m


def _tile_bytes(rows, cols, itemsize):
    sub = 8 * max(1, 4 // itemsize)          # f32: 8 sublanes, bf16: 16, int8: 32
    return _ceil_to(max(rows, 1), sub) * _ceil_to(max(cols, 1), 128) * itemsize


@functools.lru_cache(maxsize=1)
def _vmem_budget():
    mib = 1024 * 1024
    cap = 64 * mib                            # v7x-safe fallback
    try:
        cap = int(getattr(pltpu.get_tpu_info(), "vmem_capacity_bytes", cap))
    except Exception:
        pass
    # 48 MiB limit on v7x (64 MiB VMEM), ~100 MiB on v5e/v6e (128 MiB parts).
    limit = min(max(cap - 16 * mib, 32 * mib), 100 * mib)
    budget = (limit * 3) // 5                 # share accounted to our buffers
    return budget, limit


def _pick_c_tile(nc, h_in, w_in, h_out, w_out, itemsize, budget_bytes):
    def step_bytes(t):
        in_blk = t * _tile_bytes(h_in, w_in, itemsize)
        out_blk = t * _tile_bytes(h_out, w_out, itemsize)
        sel = _tile_bytes(w_in, w_out, itemsize)          # in-kernel one-hot
        inter = (_tile_bytes(t * h_in, w_out, 4)          # f32 matmul result
                 + _tile_bytes(t * h_in, w_out, itemsize) # cast copy
                 + _tile_bytes(t * h_in, w_in, itemsize)) # reshaped lhs
        idx = 2 * _tile_bytes(1, w_out, 4)                # (1, W_out) index vec
        return 2 * (in_blk + out_blk) + sel + inter + idx

    feasible = [t for t in range(1, min(nc, 256) + 1)
                if step_bytes(t) <= budget_bytes]
    if not feasible:
        feasible = [1]

    def score(t):
        steps = -(-nc // t)
        waste = steps * t - nc
        m = t * h_in
        return (min(steps, 4),                              # feed both v7x cores
                1 if (steps % 2 == 0 or steps == 1) else 0,  # even step count
                2 * (m % 256 == 0) + (m % 128 == 0),         # MXU-friendly M
                -waste,                                      # avoid padded tail
                t)                                           # biggest slab

    return max(feasible, key=score)


# ----------------------------------------------------------------------------
# Cached builder + host wrapper
# ----------------------------------------------------------------------------
@functools.lru_cache(maxsize=64)
def _build_resize(nc, h_in, w_in, h_out, w_out, dtype_name):
    dtype = jnp.dtype(dtype_name)
    itemsize = dtype.itemsize
    hi = _nearest_indices(h_out, h_in)
    wi = _nearest_indices(w_out, w_in)
    w_identity = bool(w_out == w_in and np.array_equal(wi, np.arange(w_in)))
    row_runs = _row_runs(hi)

    budget, vmem_limit = _vmem_budget()
    c_tile = _pick_c_tile(nc, h_in, w_in, h_out, w_out, itemsize, budget)
    grid = -(-nc // c_tile)   # cdiv; Pallas masks the out-of-bounds tail block
    precision = (jax.lax.Precision.HIGHEST if dtype == jnp.float32
                 else jax.lax.Precision.DEFAULT)

    kernel = functools.partial(
        _resize_kernel, c_tile=c_tile, h_in=h_in, w_in=w_in, w_out=w_out,
        row_runs=row_runs, w_identity=w_identity, precision=precision)

    fn = pl.pallas_call(
        kernel,
        out_shape=jax.ShapeDtypeStruct((nc, h_out, w_out), dtype),
        grid_spec=pltpu.PrefetchScalarGridSpec(
            num_scalar_prefetch=0,
            grid=(grid,),
            in_specs=[
                pl.BlockSpec((c_tile, h_in, w_in), lambda i: (i, 0, 0)),
                pl.BlockSpec((1, w_out), lambda i: (0, 0)),
            ],
            out_specs=pl.BlockSpec((c_tile, h_out, w_out), lambda i: (i, 0, 0)),
        ),
        compiler_params=pltpu.CompilerParams(
            dimension_semantics=("parallel",),
            vmem_limit_bytes=vmem_limit,
        ),
    )
    return fn, wi.reshape(1, w_out)


@functools.partial(jax.jit, static_argnums=(1,))
def _nearest_resize_nchw_jit(x, size):
    N, C, h_in, w_in = x.shape
    h_out, w_out = size
    fn, wi_np = _build_resize(N * C, h_in, w_in, h_out, w_out, str(x.dtype))
    out3 = fn(x.reshape(N * C, h_in, w_in), jnp.asarray(wi_np))
    return out3.reshape(N, C, h_out, w_out)


def nearest_resize_nchw(x: jax.Array, size) -> jax.Array:
    """Pallas nearest-neighbor resize of an NCHW batch to spatial `size`."""
    if not jnp.issubdtype(x.dtype, jnp.floating):
        # TODO(synk): integer image dtypes are not kernelized; exact for <2^24.
        x = x.astype(jnp.float32)
    return _nearest_resize_nchw_jit(x, (int(size[0]), int(size[1])))


# ----------------------------------------------------------------------------
# Module mirror
# ----------------------------------------------------------------------------
class BackboneJax:
    """JAX/Pallas mirror of boda Backbone (abstract; carries no parameters)."""

    backbone_name: str = ""

    def __init__(self):
        self.channels = []  # as in the PyTorch __init__

    def forward(self, inputs):
        # TODO(synk): Backbone.forward is abstract (`...`) in the reference.
        raise NotImplementedError

    @classmethod
    def resize_inputs(cls, inputs, size, mode: str = "nearest",
                      preserve_aspect_ratio: bool = False):
        """Mirror of ModelMixin.resize_inputs (preserve_aspect_ratio=False path).

        `inputs`: list of (C, H, W) arrays.  Returns (images, image_sizes)
        with images of shape (N, C, *size).
        """
        assert mode == "nearest"
        # TODO(synk): preserve_aspect_ratio=True (bilinear + pad batching) not kernelized.
        assert not preserve_aspect_ratio
        image_sizes = [tuple(t.shape[-2:]) for t in inputs]
        x = jnp.stack(list(inputs), axis=0)          # (N, C, H, W)
        images = nearest_resize_nchw(x, size)        # hot path: Pallas kernel
        return images, image_sizes


# ----------------------------------------------------------------------------
# Reference + self-test
# ----------------------------------------------------------------------------
def _nearest_ref(x, size):
    """Pure-numpy reference for F.interpolate(mode='nearest')."""
    _, _, H_in, W_in = x.shape
    H_out, W_out = size
    hi = np.clip((np.arange(H_out, dtype=np.int64) * H_in) // H_out, 0, H_in - 1)
    wi = np.clip((np.arange(W_out, dtype=np.int64) * W_in) // W_out, 0, W_in - 1)
    xn = np.asarray(x)
    return xn[:, :, hi][:, :, :, wi]


if __name__ == "__main__":
    key = jax.random.PRNGKey(0)
    N, C, H, W = 2, 4, 16, 16
    OUT_SIZE = (32, 32)

    keys = jax.random.split(key, N)
    inputs = [jax.random.normal(k, (C, H, W), dtype=jnp.float32) for k in keys]

    images, image_sizes = BackboneJax.resize_inputs(inputs, OUT_SIZE, mode="nearest")
    images = jax.block_until_ready(images)

    ref = _nearest_ref(np.stack([np.asarray(t) for t in inputs], axis=0), OUT_SIZE)
    assert images.shape == (N, C, *OUT_SIZE), images.shape
    assert image_sizes == [(H, W)] * N
    np.testing.assert_allclose(np.asarray(images), ref, rtol=1e-6, atol=1e-6)
    print("KERNEL_OK")
</pallas_src>

<mosaic_0001>
module attributes {stable_mosaic.version = 11 : i64} {
  func.func @_resize_kernel(%arg0: i32, %arg1: memref<2x16x16xf32, #tpu.memory_space<vmem>>, %arg2: memref<1x32xi32, #tpu.memory_space<vmem>>, %arg3: memref<2x32x32xf32, #tpu.memory_space<vmem>>) attributes {dimension_semantics = [#tpu.dimension_semantics<parallel>], iteration_bounds = array<i64: 4>, scalar_prefetch = 0 : i64, scratch_operands = 0 : i64, tpu.core_type = #tpu.core_type<tc>, window_params = [{transform_indices = @transform_0, window_bounds = array<i64: 2, 16, 16>}, {pipeline_mode = #tpu.pipeline_mode<synchronous>, transform_indices = @transform_1, window_bounds = array<i64: 1, 32>}, {transform_indices = @transform_2, window_bounds = array<i64: 2, 32, 32>}]} {
    %c0 = arith.constant 0 : index
    %c0_0 = arith.constant 0 : index
    %c0_1 = arith.constant 0 : index
    %0 = vector.load %arg1[%c0, %c0_0, %c0_1] : memref<2x16x16xf32, #tpu.memory_space<vmem>>, vector<2x16x16xf32>
    %1 = vector.shape_cast %0 : vector<2x16x16xf32> to vector<32x16xf32>
    %2 = tpu.iota {dimensions = array<i32: 0>} : vector<16x32xi32>
    %c0_2 = arith.constant 0 : index
    %c0_3 = arith.constant 0 : index
    %3 = vector.load %arg2[%c0_2, %c0_3] : memref<1x32xi32, #tpu.memory_space<vmem>>, vector<1x32xi32>
    %4 = vector.broadcast %3 : vector<1x32xi32> to vector<16x32xi32>
    %5 = arith.cmpi eq, %2, %4 : vector<16x32xi32>
    %6 = arith.extui %5 : vector<16x32xi1> to vector<16x32xi32>
    %7 = arith.sitofp %6 : vector<16x32xi32> to vector<16x32xf32>
    %cst = arith.constant dense<0.000000e+00> : vector<32x32xf32>
    %8 = tpu.matmul %1, %7, %cst {dimension_numbers = #tpu.dot_dimension_numbers<[1], [0], [0], [1], [0, 0, 1, 1], [], []>, precision = #tpu.contract_precision<fp32>} : vector<32x16xf32>, vector<16x32xf32>, vector<32x32xf32> -> vector<32x32xf32>
    %9 = vector.shape_cast %8 : vector<32x32xf32> to vector<2x16x32xf32>
    %10 = vector.extract_strided_slice %9 {offsets = [0, 0, 0], sizes = [2, 1, 32], strides = [1, 1, 1]} : vector<2x16x32xf32> to vector<2x1x32xf32>
    %11 = vector.shape_cast %10 : vector<2x1x32xf32> to vector<2x1x32xf32>
    %12 = vector.broadcast %11 : vector<2x1x32xf32> to vector<2x2x32xf32>
    %c0_4 = arith.constant 0 : index
    %c0_5 = arith.constant 0 : index
    %c0_6 = arith.constant 0 : index
    %13 = vector.load %arg3[%c0_4, %c0_5, %c0_6] : memref<2x32x32xf32, #tpu.memory_space<vmem>>, vector<2x2x32xf32>
    tpu.vector_store %arg3[%c0_4, %c0_5, %c0_6], %12 {strides = array<i32>} : memref<2x32x32xf32, #tpu.memory_space<vmem>>, vector<2x2x32xf32>,
    %14 = vector.extract_strided_slice %9 {offsets = [0, 1, 0], sizes = [2, 1, 32], strides = [1, 1, 1]} : vector<2x16x32xf32> to vector<2x1x32xf32>
    %15 = vector.shape_cast %14 : vector<2x1x32xf32> to vector<2x1x32xf32>
    %16 = vector.broadcast %15 : vector<2x1x32xf32> to vector<2x2x32xf32>
    %c0_7 = arith.constant 0 : index
    %c2 = arith.constant 2 : index
    %c0_8 = arith.constant 0 : index
    %17 = vector.load %arg3[%c0_7, %c2, %c0_8] : memref<2x32x32xf32, #tpu.memory_space<vmem>>, vector<2x2x32xf32>
    tpu.vector_store %arg3[%c0_7, %c2, %c0_8], %16 {strides = array<i32>} : memref<2x32x32xf32, #tpu.memory_space<vmem>>, vector<2x2x32xf32>,
    %18 = vector.extract_strided_slice %9 {offsets = [0, 2, 0], sizes = [2, 1, 32], strides = [1, 1, 1]} : vector<2x16x32xf32> to vector<2x1x32xf32>
    %19 = vector.shape_cast %18 : vector<2x1x32xf32> to vector<2x1x32xf32>
    %20 = vector.broadcast %19 : vector<2x1x32xf32> to vector<2x2x32xf32>
    %c0_9 = arith.constant 0 : index
    %c4 = arith.constant 4 : index
    %c0_10 = arith.constant 0 : index
    %21 = vector.load %arg3[%c0_9, %c4, %c0_10] : memref<2x32x32xf32, #tpu.memory_space<vmem>>, vector<2x2x32xf32>
    tpu.vector_store %arg3[%c0_9, %c4, %c0_10], %20 {strides = array<i32>} : memref<2x32x32xf32, #tpu.memory_space<vmem>>, vector<2x2x32xf32>,
    %22 = vector.extract_strided_slice %9 {offsets = [0, 3, 0], sizes = [2, 1, 32], strides = [1, 1, 1]} : vector<2x16x32xf32> to vector<2x1x32xf32>
    %23 = vector.shape_cast %22 : vector<2x1x32xf32> to vector<2x1x32xf32>
    %24 = vector.broadcast %23 : vector<2x1x32xf32> to vector<2x2x32xf32>
    %c0_11 = arith.constant 0 : index
    %c6 = arith.constant 6 : index
    %c0_12 = arith.constant 0 : index
    %25 = vector.load %arg3[%c0_11, %c6, %c0_12] : memref<2x32x32xf32, #tpu.memory_space<vmem>>, vector<2x2x32xf32>
    tpu.vector_store %arg3[%c0_11, %c6, %c0_12], %24 {strides = array<i32>} : memref<2x32x32xf32, #tpu.memory_space<vmem>>, vector<2x2x32xf32>,
    %26 = vector.extract_strided_slice %9 {offsets = [0, 4, 0], sizes = [2, 1, 32], strides = [1, 1, 1]} : vector<2x16x32xf32> to vector<2x1x32xf32>
    %27 = vector.shape_cast %26 : vector<2x1x32xf32> to vector<2x1x32xf32>
    %28 = vector.broadcast %27 : vector<2x1x32xf32> to vector<2x2x32xf32>
    %c0_13 = arith.constant 0 : index
    %c8 = arith.constant 8 : index
    %c0_14 = arith.constant 0 : index
    %29 = vector.load %arg3[%c0_13, %c8, %c0_14] : memref<2x32x32xf32, #tpu.memory_space<vmem>>, vector<2x2x32xf32>
    tpu.vector_store %arg3[%c0_13, %c8, %c0_14], %28 {strides = array<i32>} : memref<2x32x32xf32, #tpu.memory_space<vmem>>, vector<2x2x32xf32>,
    %30 = vector.extract_strided_slice %9 {offsets = [0, 5, 0], sizes = [2, 1, 32], strides = [1, 1, 1]} : vector<2x16x32xf32> to vector<2x1x32xf32>
    %31 = vector.shape_cast %30 : vector<2x1x32xf32> to vector<2x1x32xf32>
    %32 = vector.broadcast %31 : vector<2x1x32xf32> to vector<2x2x32xf32>
    %c0_15 = arith.constant 0 : index
    %c10 = arith.constant 10 : index
    %c0_16 = arith.constant 0 : index
    %33 = vector.load %arg3[%c0_15, %c10, %c0_16] : memref<2x32x32xf32, #tpu.memory_space<vmem>>, vector<2x2x32xf32>
    tpu.vector_store %arg3[%c0_15, %c10, %c0_16], %32 {strides = array<i32>} : memref<2x32x32xf32, #tpu.memory_space<vmem>>, vector<2x2x32xf32>,
    %34 = vector.extract_strided_slice %9 {offsets = [0, 6, 0], sizes = [2, 1, 32], strides = [1, 1, 1]} : vector<2x16x32xf32> to vector<2x1x32xf32>
    %35 = vector.shape_cast %34 : vector<2x1x32xf32> to vector<2x1x32xf32>
    %36 = vector.broadcast %35 : vector<2x1x32xf32> to vector<2x2x32xf32>
    %c0_17 = arith.constant 0 : index
    %c12 = arith.constant 12 : index
    %c0_18 = arith.constant 0 : index
    %37 = vector.load %arg3[%c0_17, %c12, %c0_18] : memref<2x32x32xf32, #tpu.memory_space<vmem>>, vector<2x2x32xf32>
    tpu.vector_store %arg3[%c0_17, %c12, %c0_18], %36 {strides = array<i32>} : memref<2x32x32xf32, #tpu.memory_space<vmem>>, vector<2x2x32xf32>,
    %38 = vector.extract_strided_slice %9 {offsets = [0, 7, 0], sizes = [2, 1, 32], strides = [1, 1, 1]} : vector<2x16x32xf32> to vector<2x1x32xf32>
    %39 = vector.shape_cast %38 : vector<2x1x32xf32> to vector<2x1x32xf32>
    %40 = vector.broadcast %39 : vector<2x1x32xf32> to vector<2x2x32xf32>
    %c0_19 = arith.constant 0 : index
    %c14 = arith.constant 14 : index
    %c0_20 = arith.constant 0 : index
    %41 = vector.load %arg3[%c0_19, %c14, %c0_20] : memref<2x32x32xf32, #tpu.memory_space<vmem>>, vector<2x2x32xf32>
    tpu.vector_store %arg3[%c0_19, %c14, %c0_20], %40 {strides = array<i32>} : memref<2x32x32xf32, #tpu.memory_space<vmem>>, vector<2x2x32xf32>,
    %42 = vector.extract_strided_slice %9 {offsets = [0, 8, 0], sizes = [2, 1, 32], strides = [1, 1, 1]} : vector<2x16x32xf32> to vector<2x1x32xf32>
    %43 = vector.shape_cast %42 : vector<2x1x32xf32> to vector<2x1x32xf32>
    %44 = vector.broadcast %43 : vector<2x1x32xf32> to vector<2x2x32xf32>
    %c0_21 = arith.constant 0 : index
    %c16 = arith.constant 16 : index
    %c0_22 = arith.constant 0 : index
    %45 = vector.load %arg3[%c0_21, %c16, %c0_22] : memref<2x32x32xf32, #tpu.memory_space<vmem>>, vector<2x2x32xf32>
    tpu.vector_store %arg3[%c0_21, %c16, %c0_22], %44 {strides = array<i32>} : memref<2x32x32xf32, #tpu.memory_space<vmem>>, vector<2x2x32xf32>,
    %46 = vector.extract_strided_slice %9 {offsets = [0, 9, 0], sizes = [2, 1, 32], strides = [1, 1, 1]} : vector<2x16x32xf32> to vector<2x1x32xf32>
    %47 = vector.shape_cast %46 : vector<2x1x32xf32> to vector<2x1x32xf32>
    %48 = vector.broadcast %47 : vector<2x1x32xf32> to vector<2x2x32xf32>
    %c0_23 = arith.constant 0 : index
    %c18 = arith.constant 18 : index
    %c0_24 = arith.constant 0 : index
    %49 = vector.load %arg3[%c0_23, %c18, %c0_24] : memref<2x32x32xf32, #tpu.memory_space<vmem>>, vector<2x2x32xf32>
    tpu.vector_store %arg3[%c0_23, %c18, %c0_24], %48 {strides = array<i32>} : memref<2x32x32xf32, #tpu.memory_space<vmem>>, vector<2x2x32xf32>,
    %50 = vector.extract_strided_slice %9 {offsets = [0, 10, 0], sizes = [2, 1, 32], strides = [1, 1, 1]} : vector<2x16x32xf32> to vector<2x1x32xf32>
    %51 = vector.shape_cast %50 : vector<2x1x32xf32> to vector<2x1x32xf32>
    %52 = vector.broadcast %51 : vector<2x1x32xf32> to vector<2x2x32xf32>
    %c0_25 = arith.constant 0 : index
    %c20 = arith.constant 20 : index
    %c0_26 = arith.constant 0 : index
    %53 = vector.load %arg3[%c0_25, %c20, %c0_26] : memref<2x32x32xf32, #tpu.memory_space<vmem>>, vector<2x2x32xf32>
    tpu.vector_store %arg3[%c0_25, %c20, %c0_26], %52 {strides = array<i32>} : memref<2x32x32xf32, #tpu.memory_space<vmem>>, vector<2x2x32xf32>,
    %54 = vector.extract_strided_slice %9 {offsets = [0, 11, 0], sizes = [2, 1, 32], strides = [1, 1, 1]} : vector<2x16x32xf32> to vector<2x1x32xf32>
    %55 = vector.shape_cast %54 : vector<2x1x32xf32> to vector<2x1x32xf32>
    %56 = vector.broadcast %55 : vector<2x1x32xf32> to vector<2x2x32xf32>
    %c0_27 = arith.constant 0 : index
    %c22 = arith.constant 22 : index
    %c0_28 = arith.constant 0 : index
    %57 = vector.load %arg3[%c0_27, %c22, %c0_28] : memref<2x32x32xf32, #tpu.memory_space<vmem>>, vector<2x2x32xf32>
    tpu.vector_store %arg3[%c0_27, %c22, %c0_28], %56 {strides = array<i32>} : memref<2x32x32xf32, #tpu.memory_space<vmem>>, vector<2x2x32xf32>,
    %58 = vector.extract_strided_slice %9 {offsets = [0, 12, 0], sizes = [2, 1, 32], strides = [1, 1, 1]} : vector<2x16x32xf32> to vector<2x1x32xf32>
    %59 = vector.shape_cast %58 : vector<2x1x32xf32> to vector<2x1x32xf32>
    %60 = vector.broadcast %59 : vector<2x1x32xf32> to vector<2x2x32xf32>
    %c0_29 = arith.constant 0 : index
    %c24 = arith.constant 24 : index
    %c0_30 = arith.constant 0 : index
    %61 = vector.load %arg3[%c0_29, %c24, %c0_30] : memref<2x32x32xf32, #tpu.memory_space<vmem>>, vector<2x2x32xf32>
    tpu.vector_store %arg3[%c0_29, %c24, %c0_30], %60 {strides = array<i32>} : memref<2x32x32xf32, #tpu.memory_space<vmem>>, vector<2x2x32xf32>,
    %62 = vector.extract_strided_slice %9 {offsets = [0, 13, 0], sizes = [2, 1, 32], strides = [1, 1, 1]} : vector<2x16x32xf32> to vector<2x1x32xf32>
    %63 = vector.shape_cast %62 : vector<2x1x32xf32> to vector<2x1x32xf32>
    %64 = vector.broadcast %63 : vector<2x1x32xf32> to vector<2x2x32xf32>
    %c0_31 = arith.constant 0 : index
    %c26 = arith.constant 26 : index
    %c0_32 = arith.constant 0 : index
    %65 = vector.load %arg3[%c0_31, %c26, %c0_32] : memref<2x32x32xf32, #tpu.memory_space<vmem>>, vector<2x2x32xf32>
    tpu.vector_store %arg3[%c0_31, %c26, %c0_32], %64 {strides = array<i32>} : memref<2x32x32xf32, #tpu.memory_space<vmem>>, vector<2x2x32xf32>,
    %66 = vector.extract_strided_slice %9 {offsets = [0, 14, 0], sizes = [2, 1, 32], strides = [1, 1, 1]} : vector<2x16x32xf32> to vector<2x1x32xf32>
    %67 = vector.shape_cast %66 : vector<2x1x32xf32> to vector<2x1x32xf32>
    %68 = vector.broadcast %67 : vector<2x1x32xf32> to vector<2x2x32xf32>
    %c0_33 = arith.constant 0 : index
    %c28 = arith.constant 28 : index
    %c0_34 = arith.constant 0 : index
    %69 = vector.load %arg3[%c0_33, %c28, %c0_34] : memref<2x32x32xf32, #tpu.memory_space<vmem>>, vector<2x2x32xf32>
    tpu.vector_store %arg3[%c0_33, %c28, %c0_34], %68 {strides = array<i32>} : memref<2x32x32xf32, #tpu.memory_space<vmem>>, vector<2x2x32xf32>,
    %70 = vector.extract_strided_slice %9 {offsets = [0, 15, 0], sizes = [2, 1, 32], strides = [1, 1, 1]} : vector<2x16x32xf32> to vector<2x1x32xf32>
    %71 = vector.shape_cast %70 : vector<2x1x32xf32> to vector<2x1x32xf32>
    %72 = vector.broadcast %71 : vector<2x1x32xf32> to vector<2x2x32xf32>
    %c0_35 = arith.constant 0 : index
    %c30 = arith.constant 30 : index
    %c0_36 = arith.constant 0 : index
    %73 = vector.load %arg3[%c0_35, %c30, %c0_36] : memref<2x32x32xf32, #tpu.memory_space<vmem>>, vector<2x2x32xf32>
    tpu.vector_store %arg3[%c0_35, %c30, %c0_36], %72 {strides = array<i32>} : memref<2x32x32xf32, #tpu.memory_space<vmem>>, vector<2x2x32xf32>,
    return
  }
  func.func @transform_0(%arg0: i32) -> (i32, i32, i32) {
    %c0_i32 = arith.constant 0 : i32
    %c0_i32_0 = arith.constant 0 : i32
    %c0_i32_1 = arith.constant 0 : i32
    return %arg0, %c0_i32, %c0_i32_0 : i32, i32, i32
  }
  func.func @transform_1(%arg0: i32) -> (i32, i32) {
    %c0_i32 = arith.constant 0 : i32
    %c0_i32_0 = arith.constant 0 : i32
    %c0_i32_1 = arith.constant 0 : i32
    return %c0_i32, %c0_i32_0 : i32, i32
  }
  func.func @transform_2(%arg0: i32) -> (i32, i32, i32) {
    %c0_i32 = arith.constant 0 : i32
    %c0_i32_0 = arith.constant 0 : i32
    %c0_i32_1 = arith.constant 0 : i32
    return %arg0, %c0_i32, %c0_i32_0 : i32, i32, i32
  }
}

</mosaic_0001>

<bundles_post_ra>
// kernel: _nearest_resize_nchw_jit.1
= control target key start
LH: loop header
LB: loop body
LE: loop exit
PB: predicated region body
PF: predicated region fallthrough
CT: control target
= control target key end

     0   :  { %7 = vsyncpa [#allocation3], 0  ;;  %s1686_s0 = inlined_call_operand.hbm [shape: f32[8,16,16], index: 0, kind: input, shape index: {}]   ;;  %s1687_s1 = inlined_call_operand.vmem [shape: s32[1,32], index: 1, kind: input, shape index: {}]   ;;  %s1688_s2 = inlined_call_operand.hbm [shape: f32[8,32,32], index: 2, kind: output, shape index: {}]  }
   0x1   :  { %9 = vsyncpa [#allocation3 + $0x1], 0 }
   0x2   :  { %10 = vsyncpa [#allocation4], 0 }
   0x3   :  { %12 = vsyncpa [#allocation4 + $0x1], 0  ;;  %s1375_s9 = smov 0   ;;  %s1377_s10 = smov 0  }
   0x4   :  { %s1379_s11 = smov 0   ;;  %s1381_s12 = smov 0  }
   0x5 LB: > { %s1396_s13 = sadd.s32 4294967295, %s1350_s12   ;;  %s1033_s14 = sadd.s32 4294967294, %s1350_s12   ;;  %s1350_s12 = sphi %s1381_s12, %s1702_s12   ;;  %s1346_s11 = sphi %s1379_s11, %s1701_s11   ;;  %s1342_s10 = sphi %s1377_s10, %s1700_s10   ;;  %s1338_s9 = sphi %s1375_s9, %s1699_s9  }
   0x6   : > { %s1400_s15 = sadd.s32 1, %s1350_s12   ;;  %s25_s16 = sadd.s32 1, %s1346_s11 }
   0x7   : > { %s22_s17 = ssub.s32 %s1350_s12, %s1400_s15  ;;  %p32_p0 = scmp.ne.s32.totalorder %s1346_s11, %s1342_s10 }
   0x8   : > { %p23_p1 = scmp.eq.s32.totalorder %s22_s17, 0  ;;  %p33_p2 = scmp.eq.s32.totalorder %s1350_s12, 0 }
   0x9   : > { %p38_p3 = scmp.ne.s32.totalorder %s1342_s10, %s1338_s9  ;;  %p39_p4 = scmp.eq.s32.totalorder %s1396_s13, 0 }
   0xa   : > { %s1412_s18 = scalar_select %p23_p1, %s1346_s11, %s25_s16  }
   0xb   : > { %p1414_p5 = por %p33_p2, %p32_p0  ;;  %p1418_p6 = por %p39_p4, %p38_p3 }
   0xc   : > { %p83_p7 = scmp.eq.s32.totalorder %s1396_s13, 3  ;;  %p89_p8 = scmp.eq.s32.totalorder %s1033_s14, 3 }
   0xd   : > { %p1214_p9 = scmp.lt.s32.totalorder %s1350_s12, 4  ;;  %s112_s23 = sand.u32 1, %s1346_s11  }
   0xe   : > { %p1424_p10 = por %p83_p7, %p32_p0  ;;  %p1428_p11 = por %p89_p8, %p38_p3 }
   0xf   : > { %s1059_s24 = sshll.u32 %s1350_s12, 9  ;;  %s1036_s25 = sshll.u32 %s112_s23, 5 }
  0x10   : > { %s1692_s21 = scalar_select %p1424_p10, 1, 0 }
  0x11   : > { %s1693_s22 = scalar_select %p1428_p11, 1, 0 }
  0x12   : > { %s1437_s28 = scalar_lea.hbm %s1686_s0, %s1059_s24  ;;  %s116_s29 = scalar_lea.vmem [#allocation2], %s1036_s25 }
  0x13   : > { %s124_s30 = sshll.u32 %s116_s29, 4  ;;  %p1441_p12 = pnand %p1214_p9, %p1414_p5  ;;  %s1445_s30 = int_to_ptr.vmem [resolvable:$true] %s124_s30 }
  0x14   : > { %s1447_s4 = scalar_lea.sflag [#allocation3], %s112_s23  ;;  %s1254_s5 = scalar_lea.hbm %s1437_s28, 512 }
  0x15   : > { %p1255_p13 = scmp.ne.s32.totalorder %s1437_s28, %s1254_s5  ;;  %p1256_p0 = pneg %p1441_p12 }
  0x16   : > { %s1259_s8 = scalar_lea.hbm %s1686_s0, 2048  ;;  %p1260_p3 = scmp.lt.u32.totalorder %s1437_s28, %s1686_s0 }
  0x17   : > { %p1257_p1 = pnand %p1256_p0, %p1255_p13  ;;  %p1261_p4 = scmp.lt.u32.totalorder %s1259_s8, %s1254_s5 }
  0x18   : > { %p1263_p7 = scmp.lt.u32.totalorder %s1254_s5, %s1437_s28 }
  0x19   : > { %p1258_p2 = pneg %p1257_p1  ;;  %p1262_p5 = por %p1261_p4, %p1260_p3 }
  0x1b   : > { %p1264_p8 = por %p1263_p7, %p1262_p5 }
  0x1d   : > { %p1265_p9 = pnand %p1264_p8, %p1258_p2 }
  0x1f   : > { %1268 = shalt.err (!%p1265_p9)
}
  0x20   : > { %s1269_s17 = scalar_lea.vmem %s1445_s30, 512  ;;  %s1352_s19 = smov [#allocation2]  }
  0x21   : > { %p1270_p13 = scmp.ne.s32.totalorder %s1445_s30, %s1269_s17  ;;  %s1274_s23 = sshll.u32 %s1352_s19, 4  ;;  %s1275_s23 = int_to_ptr.vmem [resolvable:$false] %s1274_s23 }
  0x22   : > { %s1276_s24 = scalar_lea.vmem %s1275_s23, 1024  ;;  %p1277_p10 = scmp.lt.s32.totalorder %s1445_s30, %s1275_s23 }
  0x23   : > { %p1272_p1 = pnand %p1270_p13, %p1256_p0  ;;  %p1278_p3 = scmp.lt.s32.totalorder %s1276_s24, %s1269_s17 }
  0x25   : > { %p1273_p11 = pneg %p1272_p1  ;;  %p1279_p4 = por %p1278_p3, %p1277_p10 }
  0x27   : > { %p1280_p5 = pnand %p1279_p4, %p1273_p11 }
  0x29   : > { %1283 = shalt.err (!%p1280_p5)
}
  0x2a   : > { %s1353_s25 = smov 128   ;;  %s1354_s26 = smov 8  }
  0x2b   : > { %1209 = dma.hbm_to_vmem [thread:$0]  (!%p1441_p12), %s1437_s28, 512, %s1445_s30, %s1447_s4, %s1353_s25, %s1353_s25, %s1354_s26  }
  0x2c   : > { %p1040_p0 = scmp.ge.s32.totalorder %s1350_s12, 1  ;;  %p132_p2 = scmp.lt.s32.totalorder %s1350_s12, 5 }
  0x2e   : > { %p133_p7 = pnand %p1040_p0, %p132_p2 }
  0x2f   : > { %s1478_s27 = sand.u32 (!%p133_p7), 1, %s1342_s10  }
  0x30   : > { %136 = sbr.rel (%p133_p7) target bundleno = 332 (0x14c), region = 28  ;;  %s1041_s29 = sshll.u32 (!%p133_p7), %s1478_s27, 5 }
  0x31   : > { %s139_s5 = scalar_lea.sflag (!%p133_p7), [#allocation3], %s1478_s27  ;;  %s142_s6 = scalar_lea.vmem (!%p133_p7), [#allocation2], %s1041_s29 }
  0x37   : > { %1329 = dma.done.wait (%p1418_p6), %s139_s5, 512  }
  0x38   : > { %1331 = vsyncadd (%p1418_p6), %s139_s5, 4294966784  ;;  %v169_v0 = vlaneseq  ;;  %vm183_vm0 = vcmask 130048   ;;  %v1043_v3 = vld [vmem:[%s1687_s1] ss:$0 sm:$0xff]  ;;  %v166_v5 = vld [vmem:[%s142_s6 + $0x8] sm:$0xff]  ;;  %v1355_v10 = vmov 0.0  }
  0x39   : > { %v165_v4 = vld [vmem:[%s142_s6] sm:$0xff]  ;;  %v188_v7 = vsel %vm183_vm0, %v166_v5, 0  ;;  %v167_v8 = vld [vmem:[%s142_s6 + $0x10] sm:$0xff]  ;;  %v168_v9 = vld [vmem:[%s142_s6 + $0x18] sm:$0xff]  ;;  %v1356_v18 = vmov 1.0|1.0  }
  0x3a   : > { %v1486_v1 = vshrl.u32 %v169_v0, 7  ;;  %v185_v6 = vsel %vm183_vm0, %v165_v4, 0  ;;  %v273_v15 = vand.u32 4294901760, %v188_v7  ;;  %v191_v19 = vsel %vm183_vm0, %v167_v8, 0  ;;  %s1042_s20 = sshll.u32 %s1478_s27, 6  ;;  %s1061_s4 = sshll.u32 %s1396_s13, 10 }
  0x3b   : > { %v263_v14 = vand.u32 4294901760, %v185_v6  ;;  %v194_v20 = vsel %vm183_vm0, %v168_v9, 0  ;;  %v283_v23 = vand.u32 4294901760, %v191_v19  ;;  %vm792_vm4 = vcmask 254976   ;;  %s1546_s3 = scalar_lea.vmem [#allocation5], %s1042_s20  ;;  %s1613_s14 = scalar_lea.hbm %s1688_s2, %s1061_s4 }
  0x3c   : > { %v171_v2 = vadd.s32 8, %v1486_v1  ;;  %vm177_vm1 = vcmp.eq.s32.totalorder %v1486_v1, %v1043_v3  ;;  %v274_v22 = vsub.f32 %v188_v7, %v273_v15  ;;  %v293_v24 = vand.u32 4294901760, %v194_v20  ;;  %s960_s7 = sshll.u32 %s1546_s3, 4  ;;  %s946_s16 = scalar_lea.sflag [#allocation4], %s1478_s27  ;;  %s1615_s7 = int_to_ptr.vmem [resolvable:$true] %s960_s7 }
  0x3d   : > { %v1044_v11 = vsel %vm177_vm1, 1.0, %v1355_v10  ;;  %v264_v21 = vsub.f32 %v185_v6, %v263_v14  ;;  %v284_v29 = vsub.f32 %v191_v19, %v283_v23  ;;  %v1515_v50 = vsub.s32 0, %v1486_v1  ;;  %s1284_s17 = scalar_lea.vmem %s1615_s7, 1024  ;;  %p1697_p10 = scmp.ne.s32.totalorder %s1692_s21, 0 }
  0x3e   : > { %vm178_vm2 = vcmp.eq.s32.totalorder %v171_v2, %v1043_v3  ;;  %v305_v16 = vsub.f32 %v1044_v11, %v1044_v11  ;;  %v275_v28 = vand.u32 4294901760, %v274_v22  ;;  %v294_v30 = vsub.f32 %v194_v20, %v293_v24  ;;  %p1285_p6 = scmp.ne.s32.totalorder %s1615_s7, %s1284_s17  ;;  %s1357_s19 = smov [#allocation5]  }
  0x3f   : > { %v1045_v12 = vsel %vm178_vm2, 1.0, %v1355_v10  ;;  %vm1495_vm3 = vmpackc.low %vm178_vm2, %vm177_vm1  ;;  %v265_v27 = vand.u32 4294901760, %v264_v21  ;;  %v285_v35 = vand.u32 4294901760, %v284_v29  ;;  %v1518_v51 = vsub.s32 1, %v1486_v1  ;;  %s1288_s23 = sshll.u32 %s1357_s19, 4  ;;  %s1289_s23 = int_to_ptr.vmem [resolvable:$false] %s1288_s23 }
  0x40   : > { %v312_v17 = vsub.f32 %v1045_v12, %v1045_v12  ;;  %1171 = vmatprep.subr.msk.bf16.mxu0 %vm1495_vm3, %v1356_v18  ;;  %1159 = vmatprep.subr.msk.bf16.mxu1 %vm1495_vm3, %v1356_v18  ;;  %v306_v25 = vand.u32 4294901760, %v305_v16  ;;  %v276_v36 = vsub.f32 %v274_v22, %v275_v28  ;;  %v295_v37 = vand.u32 4294901760, %v294_v30  ;;  %p1286_p11 = pnand %p1285_p6, %p1697_p10  ;;  %s1290_s24 = scalar_lea.vmem %s1289_s23, 2048 }
  0x41   : > { %1173 = vmatpush3.bf16.msk.msra.mxu0 %vm1495_vm3, %v1356_v18  ;;  %1161 = vmatpush3.bf16.msk.msra.mxu1 %vm1495_vm3, %v1356_v18  ;;  %v266_v34 = vsub.f32 %v264_v21, %v265_v27  ;;  %v286_v42 = vsub.f32 %v284_v29, %v285_v35  ;;  %v1521_v52 = vsub.s32 2, %v1486_v1  ;;  %v1524_v53 = vsub.s32 3, %v1486_v1  ;;  %p1291_p8 = scmp.lt.s32.totalorder %s1615_s7, %s1289_s23  ;;  %p1292_p9 = scmp.lt.s32.totalorder %s1290_s24, %s1284_s17 }
  0x42   : > { %v313_v26 = vand.u32 4294901760, %v312_v17  ;;  %v307_v31 = vsub.f32 %v305_v16, %v306_v25  ;;  %1132 = vmatprep.mubr.f32.mxu0 %v265_v27  ;;  %v277_v41 = vand.u32 4294901760, %v276_v36  ;;  %v296_v43 = vsub.f32 %v294_v30, %v295_v37  ;;  %p1287_p12 = pneg %p1286_p11 }
  0x43   : > { %v267_v40 = vand.u32 4294901760, %v266_v34  ;;  %v287_v45 = vand.u32 4294901760, %v286_v42  ;;  %v1166_v46 = vpack.c.bf16 %v312_v17, %v305_v16  ;;  %v1527_v55 = vsub.s32 4, %v1486_v1  ;;  %p1293_p13 = por %p1292_p9, %p1291_p8 }
  0x44   : > { %v314_v32 = vsub.f32 %v312_v17, %v313_v26  ;;  %v1174_v33 = vpack.c.bf16 %v313_v26, %v306_v25  ;;  %1133 = vmatmul.mubr.f32.vlgmr.msra.gmra.mrb[0].mxu0 %v275_v28  ;;  %v308_v38 = vand.u32 4294901760, %v307_v31  ;;  %v297_v47 = vand.u32 4294901760, %v296_v43 }
  0x45   : > { %1135 = vmatprep.mubr.f32.mxu0 %v285_v35  ;;  %1102 = vmatprep.mubr.f32.mxu1 %v267_v40  ;;  %v1530_v56 = vsub.s32 5, %v1486_v1  ;;  %v1533_v57 = vsub.s32 6, %v1486_v1  ;;  %v1536_v58 = vsub.s32 7, %v1486_v1  ;;  %p1294_p1 = pnand %p1293_p13, %p1287_p12 }
  0x46   : > { %v315_v39 = vand.u32 4294901760, %v314_v32  ;;  %1175 = vmatprep.subr.bf16.mxu0 %v1174_v33  ;;  %1103 = vmatmul.mubr.f32.vlgmr.msra.gmra.mrb[0].mxu1 %v277_v41 }
  0x47   : > { %1177 = vmatpush3.bf16.msra.mxu0 %v1174_v33  ;;  %1105 = vmatprep.mubr.f32.mxu1 %v287_v45 }
  0x48   : > { %v1162_v44 = vpack.c.bf16 %v315_v39, %v308_v38  ;;  %1179 = vmatprep.subr.msk.bf16.mxu0 %vm1495_vm3, %v1356_v18  ;;  %1136 = vmatmul.mubr.f32.gmra.mrb[2].mxu0 %v295_v37 }
  0x49   : > { %1142 = vmatprep.mubr.f32.mxu0 %v263_v14 }
  0x4a   : > { %1163 = vmatprep.subr.bf16.mxu1 %v1162_v44  ;;  %1106 = vmatmul.mubr.f32.gmra.mrb[2].mxu1 %v297_v47 }
  0x4b   : > { %1165 = vmatpush3.bf16.msra.mxu1 %v1162_v44  ;;  %1112 = vmatprep.mubr.f32.mxu1 %v263_v14 }
  0x4c   : > { %1167 = vmatprep.subr.bf16.mxu1 %v1166_v46  ;;  %1143 = vmatmul.mubr.f32.vlgmr.msra.gmra.mrb[0].mxu0 %v273_v15 }
  0x4d   : > { %1145 = vmatprep.mubr.f32.mxu0 %v283_v23  ;;  %1181 = vmatpush3.bf16.msk.msra.mxu0 %vm1495_vm3, %v1356_v18 }
  0x4e   : > { %1113 = vmatmul.mubr.f32.vlgmr.msra.gmra.mrb[0].mxu1 %v273_v15 }
  0x4f   : > { %1169 = vmatpush3.bf16.msra.mxu1 %v1166_v46  ;;  %1115 = vmatprep.mubr.f32.mxu1 %v283_v23 }
  0x50   : > { %1146 = vmatmul.mubr.f32.gmra.mrb[2].mxu0 %v293_v24 }
  0x51   : > { %1152 = vmatprep.mubr.f32.mxu0 %v263_v14 }
  0x52   : > { %1116 = vmatmul.mubr.f32.gmra.mrb[2].mxu1 %v293_v24 }
  0x53   : > { %1122 = vmatprep.mubr.f32.mxu1 %v264_v21 }
  0x54   : > { %1153 = vmatmul.mubr.f32.vlgmr.msra.gmra.mrb[0].mxu0 %v273_v15 }
  0x55   : > { %1155 = vmatprep.mubr.f32.mxu0 %v283_v23 }
  0x56   : > { %1123 = vmatmul.mubr.f32.vlgmr.msra.gmra.mrb[0].mxu1 %v274_v22 }
  0x57   : > { %1125 = vmatprep.mubr.f32.mxu1 %v284_v29 }
  0x58   : > { %1156 = vmatmul.mubr.f32.gmra.mrb[2].mxu0 %v293_v24 }
  0x5a   : > { %1126 = vmatmul.mubr.f32.gmra.mrb[2].mxu1 %v294_v30 }
 0x127   : > { %v1154_v48 = vpop.f32.mrb[0].mxu0 }
 0x128   : > { %v762_v49 = vpop.f32.mrb[1].mxu0 }
 0x129   : > { %v1124_v54 = vpop.f32.mrb[0].mxu1 }
 0x12a   : > { %v1182_v59 = vadd.f32 %v1154_v48, %v1124_v54  ;;  %v474_v61 = vpop.f32.mrb[1].mxu1 }
 0x12b   : > { %v1157_v60 = vpop.f32.mrb[2].mxu0  ;;  %v1183_v62 = vadd.f32 %v762_v49, %v474_v61 }
 0x12c   : > { %v774_v63 = vpop.f32.mrb[3].mxu0  ;;  %v868_v0 = vrot.slane %v1182_v59, %v1515_v50  ;;  %v878_v2 = vrot.slane %v1182_v59, %v1518_v51  ;;  %v888_v3 = vrot.slane %v1182_v59, %v1521_v52  ;;  %v898_v4 = vrot.slane %v1182_v59, %v1524_v53 }
 0x12d   : > { %v908_v5 = vrot.slane %v1182_v59, %v1527_v55  ;;  %v918_v6 = vrot.slane %v1182_v59, %v1530_v56  ;;  %v928_v1 = vrot.slane %v1182_v59, %v1533_v57  ;;  %v938_v7 = vrot.slane %v1182_v59, %v1536_v58  ;;  %v1127_v8 = vpop.f32.mrb[2].mxu1 }
 0x12e   : > { %873 = vst.msk [vmem:[%s1546_s3 + $0x10] sm:$0x3] %vm792_vm4, %v868_v0  ;;  %883 = vst.msk [vmem:[%s1546_s3 + $0x12] sm:$0x3] %vm792_vm4, %v878_v2  ;;  %v787_v9 = vrot.slane %v1183_v62, %v1515_v50  ;;  %v798_v10 = vrot.slane %v1183_v62, %v1518_v51  ;;  %v808_v11 = vrot.slane %v1183_v62, %v1521_v52  ;;  %v488_v13 = vpop.f32.mrb[3].mxu1 }
 0x12f   : > { %893 = vst.msk [vmem:[%s1546_s3 + $0x14] sm:$0x3] %vm792_vm4, %v888_v3  ;;  %903 = vst.msk [vmem:[%s1546_s3 + $0x16] sm:$0x3] %vm792_vm4, %v898_v4  ;;  %v818_v12 = vrot.slane %v1183_v62, %v1524_v53  ;;  %v828_v14 = vrot.slane %v1183_v62, %v1527_v55  ;;  %v838_v15 = vrot.slane %v1183_v62, %v1530_v56 }
 0x130   : > { %913 = vst.msk [vmem:[%s1546_s3 + $0x18] sm:$0x3] %vm792_vm4, %v908_v5  ;;  %923 = vst.msk [vmem:[%s1546_s3 + $0x1a] sm:$0x3] %vm792_vm4, %v918_v6  ;;  %v848_v16 = vrot.slane %v1183_v62, %v1533_v57  ;;  %v858_v17 = vrot.slane %v1183_v62, %v1536_v58  ;;  %v1184_v18 = vadd.f32 %v1157_v60, %v1127_v8 }
 0x131   : > { %933 = vst.msk [vmem:[%s1546_s3 + $0x1c] sm:$0x3] %vm792_vm4, %v928_v1  ;;  %943 = vst.msk [vmem:[%s1546_s3 + $0x1e] sm:$0x3] %vm792_vm4, %v938_v7  ;;  %v1185_v19 = vadd.f32 %v774_v63, %v488_v13 }
 0x132   : > { %793 = vst.msk [vmem:[%s1546_s3] sm:$0x3] %vm792_vm4, %v787_v9  ;;  %803 = vst.msk [vmem:[%s1546_s3 + $0x2] sm:$0x3] %vm792_vm4, %v798_v10  ;;  %v872_v20 = vrot.slane %v1184_v18, %v1515_v50  ;;  %v882_v21 = vrot.slane %v1184_v18, %v1518_v51  ;;  %v892_v22 = vrot.slane %v1184_v18, %v1521_v52 }
 0x133   : > { %813 = vst.msk [vmem:[%s1546_s3 + $0x4] sm:$0x3] %vm792_vm4, %v808_v11  ;;  %823 = vst.msk [vmem:[%s1546_s3 + $0x6] sm:$0x3] %vm792_vm4, %v818_v12  ;;  %v902_v23 = vrot.slane %v1184_v18, %v1524_v53  ;;  %v912_v24 = vrot.slane %v1184_v18, %v1527_v55  ;;  %v922_v25 = vrot.slane %v1184_v18, %v1530_v56 }
 0x134   : > { %833 = vst.msk [vmem:[%s1546_s3 + $0x8] sm:$0x3] %vm792_vm4, %v828_v14  ;;  %843 = vst.msk [vmem:[%s1546_s3 + $0xa] sm:$0x3] %vm792_vm4, %v838_v15  ;;  %v932_v26 = vrot.slane %v1184_v18, %v1533_v57  ;;  %v942_v27 = vrot.slane %v1184_v18, %v1536_v58  ;;  %v791_v28 = vrot.slane %v1185_v19, %v1515_v50 }
 0x135   : > { %853 = vst.msk [vmem:[%s1546_s3 + $0xc] sm:$0x3] %vm792_vm4, %v848_v16  ;;  %863 = vst.msk [vmem:[%s1546_s3 + $0xe] sm:$0x3] %vm792_vm4, %v858_v17  ;;  %v802_v29 = vrot.slane %v1185_v19, %v1518_v51  ;;  %v812_v30 = vrot.slane %v1185_v19, %v1521_v52  ;;  %v822_v31 = vrot.slane %v1185_v19, %v1524_v53 }
 0x136   : > { %874 = vst.msk [vmem:[%s1546_s3 + $0x30] sm:$0x3] %vm792_vm4, %v872_v20  ;;  %884 = vst.msk [vmem:[%s1546_s3 + $0x32] sm:$0x3] %vm792_vm4, %v882_v21  ;;  %v832_v32 = vrot.slane %v1185_v19, %v1527_v55  ;;  %v842_v33 = vrot.slane %v1185_v19, %v1530_v56  ;;  %v852_v34 = vrot.slane %v1185_v19, %v1533_v57 }
 0x137   : > { %894 = vst.msk [vmem:[%s1546_s3 + $0x34] sm:$0x3] %vm792_vm4, %v892_v22  ;;  %904 = vst.msk [vmem:[%s1546_s3 + $0x36] sm:$0x3] %vm792_vm4, %v902_v23  ;;  %v862_v35 = vrot.slane %v1185_v19, %v1536_v58 }
 0x138   : > { %914 = vst.msk [vmem:[%s1546_s3 + $0x38] sm:$0x3] %vm792_vm4, %v912_v24  ;;  %924 = vst.msk [vmem:[%s1546_s3 + $0x3a] sm:$0x3] %vm792_vm4, %v922_v25 }
 0x139   : > { %934 = vst.msk [vmem:[%s1546_s3 + $0x3c] sm:$0x3] %vm792_vm4, %v932_v26  ;;  %944 = vst.msk [vmem:[%s1546_s3 + $0x3e] sm:$0x3] %vm792_vm4, %v942_v27 }
 0x13a   : > { %794 = vst.msk [vmem:[%s1546_s3 + $0x20] sm:$0x3] %vm792_vm4, %v791_v28  ;;  %804 = vst.msk [vmem:[%s1546_s3 + $0x22] sm:$0x3] %vm792_vm4, %v802_v29 }
 0x13b   : > { %814 = vst.msk [vmem:[%s1546_s3 + $0x24] sm:$0x3] %vm792_vm4, %v812_v30  ;;  %824 = vst.msk [vmem:[%s1546_s3 + $0x26] sm:$0x3] %vm792_vm4, %v822_v31 }
 0x13c   : > { %834 = vst.msk [vmem:[%s1546_s3 + $0x28] sm:$0x3] %vm792_vm4, %v832_v32  ;;  %844 = vst.msk [vmem:[%s1546_s3 + $0x2a] sm:$0x3] %vm792_vm4, %v842_v33 }
 0x13d   : > { %854 = vst.msk [vmem:[%s1546_s3 + $0x2c] sm:$0x3] %vm792_vm4, %v852_v34  ;;  %864 = vst.msk [vmem:[%s1546_s3 + $0x2e] sm:$0x3] %vm792_vm4, %v862_v35 }
 0x13e   : > { %1297 = shalt.err (!%p1294_p1)
}
 0x13f   : > { %s1298_s25 = scalar_lea.hbm %s1613_s14, 1024  ;;  %s1302_s5 = scalar_lea.hbm %s1688_s2, 4096 }
 0x140   : > { %p1299_p3 = scmp.ne.s32.totalorder %s1613_s14, %s1298_s25  ;;  %p1303_p0 = scmp.lt.u32.totalorder %s1613_s14, %s1688_s2 }
 0x141   : > { %p1304_p2 = scmp.lt.u32.totalorder %s1302_s5, %s1298_s25  ;;  %p1306_p6 = scmp.lt.u32.totalorder %s1298_s25, %s1613_s14 }
 0x142   : > { %p1300_p4 = pnand %p1299_p3, %p1697_p10 }
 0x143   : > { %p1305_p7 = por %p1304_p2, %p1303_p0 }
 0x144   : > { %p1301_p5 = pneg %p1300_p4 }
 0x145   : > { %p1307_p11 = por %p1306_p6, %p1305_p7 }
 0x147   : > { %p1308_p12 = pnand %p1307_p11, %p1301_p5 }
 0x149   : > { %1311 = shalt.err (!%p1308_p12)
}
 0x14a   : > { %s1358_s30 = smov 128   ;;  %s1359_s20 = smov 8  }
 0x14b   : > { %1204 = dma.vmem_to_hbm [thread:$0]  (%p1697_p10), %s1615_s7, 1024, %s1613_s14, %s946_s16, %s1358_s30, %s1358_s30, %s1359_s20  }
 0x14c PF: > { %p1215_p8 = scmp.ge.s32.totalorder %s1350_s12, 2  ;;  %s975_s3 = sand.u32 1, %s1338_s9  }
 0x14d   : > { %p1698_p9 = scmp.ne.s32.totalorder %s1693_s22, 0  ;;  %s976_s4 = scalar_lea.sflag [#allocation4], %s975_s3 }
 0x14f   : > { %p1211_p13 = pnand %p1215_p8, %p1698_p9 }
 0x151   : > { %1333 = dma.done.wait (!%p1211_p13), %s976_s4, 1024  }
 0x152   : > { %1335 = vsyncadd (!%p1211_p13), %s976_s4, 4294966272  ;;  %p15_p1 = scmp.ge.s32.totalorder %s1400_s15, 6   ;;  %s1699_s9 = smov %s1342_s10 }
 0x153   : > { %s1700_s10 = smov %s1346_s11  ;;  %s1701_s11 = smov %s1412_s18 }
 0x154   : > { %s1702_s12 = smov %s1400_s15  ;;  %17 = sbr.rel (!%p15_p1) target bundleno = 5 (0x5), region = 73 }
 0x15b   :  { %981 = vsyncpa [#allocation3], 1 }
 0x15c   :  { %983 = vsyncpa [#allocation3 + $0x1], 1 }
 0x15d   :  { %984 = vsyncpa [#allocation4], 1 }
 0x15e   :  { %986 = vsyncpa [#allocation4 + $0x1], 1 }

</bundles_post_ra>
